<compile_context>
chip_gen: v6e
topology: v6e:2x2x1
jax: 0.10.0
libtpu: 0.0.40
codegen_flags: <defaults>
</compile_context>

<pallas_src>
import functools

import jax
import jax.numpy as jnp
from jax.experimental import pallas as pl
from jax.experimental.pallas import tpu as pltpu


def decoder_kernel(x_ref, w1_ref, b1_ref, w2_ref, b2_ref, o_ref):
    # x arrives as f32 (single HBM read); cast to bf16 in vregs for the MXU.
    x = x_ref[...].astype(jnp.bfloat16)
    # fc1: bf16 operands on MXU, f32 accumulate; epilogue (bias + relu) in f32 on VPU.
    h = jnp.dot(x, w1_ref[...], preferred_element_type=jnp.float32)
    h = jnp.maximum(h + b1_ref[...], 0.0)
    # fc2: cast relu output to bf16 for the MXU, accumulate in f32.
    y = jnp.dot(h.astype(jnp.bfloat16), w2_ref[...],
                preferred_element_type=jnp.float32)
    y = y + b2_ref[...]
    # Sigmoid in f32 (v5e has no bf16 EUP); cast only on the store.
    o_ref[...] = jax.nn.sigmoid(y).astype(o_ref.dtype)


def _round_up(x, m):
    return ((x + m - 1) // m) * m


@functools.partial(jax.jit, static_argnames=("block_b", "out_dtype"))
def decoder_forward(x, w1, b1, w2, b2, *, block_b=4096, out_dtype=jnp.float32):
    """x: [B, bottleneck] f32; w1: [bottleneck, hidden]; w2: [hidden, output];
    b1: [1, hidden]; b2: [1, output]. Returns [B, output] in out_dtype."""
    B, in_dim = x.shape
    hid = w1.shape[1]
    out_dim = w2.shape[1]

    # Batch tile: multiple of 16 sublanes (bf16 packing), no larger than padded batch.
    tb = min(_round_up(block_b, 16), _round_up(B, 16))
    Bp = _round_up(B, tb)
    if Bp != B:
        x = jnp.pad(x, ((0, Bp - B), (0, 0)))

    # Weights are tiny and VMEM-resident: cast once in the wrapper. x is NOT cast
    # here (would be a separate un-fusable HBM pass); it is cast inside the kernel.
    w1_bf = w1.astype(jnp.bfloat16)
    w2_bf = w2.astype(jnp.bfloat16)

    grid = (Bp // tb,)
    out_bytes = jnp.dtype(out_dtype).itemsize

    # Scoped-VMEM budget: double-buffered f32 x tile + double-buffered out tile +
    # resident bf16 weights / f32 biases + f32 h intermediate, with 2x margin.
    # At tb=4096 and the demo dims this is ~12 MiB: under v7x's 32 MiB default
    # scoped limit and far under its 64 MiB physical VMEM.
    vmem_bytes = int(
        2 * tb * in_dim * 4              # x, double-buffered, f32
        + 2 * tb * out_dim * out_bytes   # out, double-buffered
        + in_dim * hid * 2               # w1 (bf16, resident)
        + hid * out_dim * 2              # w2 (bf16, resident)
        + (hid + out_dim) * 4            # biases (f32, resident)
        + 2 * tb * hid * 4               # h intermediate (f32 + bf16 copy slack)
    ) * 2
    vmem_bytes = max(vmem_bytes, 4 << 20)

    out = pl.pallas_call(
        decoder_kernel,
        out_shape=jax.ShapeDtypeStruct((Bp, out_dim), out_dtype),
        grid=grid,
        in_specs=[
            pl.BlockSpec((tb, in_dim), lambda i: (i, 0)),      # x: streamed per batch tile (f32)
            pl.BlockSpec((in_dim, hid), lambda i: (0, 0)),     # w1: resident
            pl.BlockSpec((1, hid), lambda i: (0, 0)),          # b1: resident
            pl.BlockSpec((hid, out_dim), lambda i: (0, 0)),    # w2: resident
            pl.BlockSpec((1, out_dim), lambda i: (0, 0)),      # b2: resident
        ],
        out_specs=pl.BlockSpec((tb, out_dim), lambda i: (i, 0)),
        compiler_params=pltpu.CompilerParams(
            dimension_semantics=("parallel",),   # batch axis is independent across tiles
            vmem_limit_bytes=vmem_bytes,
        ),
    )(x, w1_bf, b1, w2_bf, b2)

    return out[:B] if Bp != B else out


def init_linear_params(key, in_dim, out_dim):
    """Deterministic init mimicking nn.Linear default (uniform +-1/sqrt(in_dim)).
    Returns weight transposed to [in_dim, out_dim] and bias as [1, out_dim]."""
    kw, kb = jax.random.split(key)
    bound = 1.0 / jnp.sqrt(jnp.float32(in_dim))
    w = jax.random.uniform(kw, (in_dim, out_dim), jnp.float32, -bound, bound)
    b = jax.random.uniform(kb, (1, out_dim), jnp.float32, -bound, bound)
    return w, b


if __name__ == "__main__":
    # Small shapes consistent with the module's forward.
    batch = 8
    bottleneck_dim = 32
    hidden_dim = 64
    output_dim = 128

    key = jax.random.PRNGKey(0)
    kx, k1, k2 = jax.random.split(key, 3)

    x = jax.random.normal(kx, (batch, bottleneck_dim), jnp.float32)
    w1, b1 = init_linear_params(k1, bottleneck_dim, hidden_dim)
    w2, b2 = init_linear_params(k2, hidden_dim, output_dim)

    out = decoder_forward(x, w1, b1, w2, b2)
    out = jax.block_until_ready(out)

    # Pure-JAX f32 reference check (kernel uses bf16 MXU operands -> loose tolerance).
    ref = jax.nn.sigmoid(jnp.maximum(x @ w1 + b1, 0.0) @ w2 + b2)
    assert out.shape == (batch, output_dim)
    assert out.dtype == jnp.float32
    assert jnp.allclose(out, ref, atol=2e-2, rtol=2e-2)

    print("KERNEL_OK")
</pallas_src>

<mosaic_0001>
module attributes {stable_mosaic.version = 11 : i64} {
  func.func @decoder_kernel(%arg0: i32, %arg1: memref<16x32xf32, #tpu.memory_space<vmem>>, %arg2: memref<32x64xbf16, #tpu.memory_space<vmem>>, %arg3: memref<1x64xf32, #tpu.memory_space<vmem>>, %arg4: memref<64x128xbf16, #tpu.memory_space<vmem>>, %arg5: memref<1x128xf32, #tpu.memory_space<vmem>>, %arg6: memref<16x128xf32, #tpu.memory_space<vmem>>) attributes {dimension_semantics = [#tpu.dimension_semantics<parallel>], iteration_bounds = array<i64: 1>, scalar_prefetch = 0 : i64, scratch_operands = 0 : i64, tpu.core_type = #tpu.core_type<tc>, window_params = [{transform_indices = @transform_0, window_bounds = array<i64: 16, 32>}, {pipeline_mode = #tpu.pipeline_mode<synchronous>, transform_indices = @transform_1, window_bounds = array<i64: 32, 64>}, {pipeline_mode = #tpu.pipeline_mode<synchronous>, transform_indices = @transform_2, window_bounds = array<i64: 1, 64>}, {pipeline_mode = #tpu.pipeline_mode<synchronous>, transform_indices = @transform_3, window_bounds = array<i64: 64, 128>}, {pipeline_mode = #tpu.pipeline_mode<synchronous>, transform_indices = @transform_4, window_bounds = array<i64: 1, 128>}, {transform_indices = @transform_5, window_bounds = array<i64: 16, 128>}]} {
    %c0 = arith.constant 0 : index
    %c0_0 = arith.constant 0 : index
    %0 = vector.load %arg1[%c0, %c0_0] : memref<16x32xf32, #tpu.memory_space<vmem>>, vector<16x32xf32>
    %1 = arith.truncf %0 : vector<16x32xf32> to vector<16x32xbf16>
    %c0_1 = arith.constant 0 : index
    %c0_2 = arith.constant 0 : index
    %2 = vector.load %arg2[%c0_1, %c0_2] : memref<32x64xbf16, #tpu.memory_space<vmem>>, vector<32x64xbf16>
    %cst = arith.constant dense<0.000000e+00> : vector<16x64xf32>
    %3 = tpu.matmul %1, %2, %cst {dimension_numbers = #tpu.dot_dimension_numbers<[1], [0], [0], [1], [0, 0, 1, 1], [], []>} : vector<16x32xbf16>, vector<32x64xbf16>, vector<16x64xf32> -> vector<16x64xf32>
    %c0_3 = arith.constant 0 : index
    %c0_4 = arith.constant 0 : index
    %4 = vector.load %arg3[%c0_3, %c0_4] : memref<1x64xf32, #tpu.memory_space<vmem>>, vector<1x64xf32>
    %5 = vector.broadcast %4 : vector<1x64xf32> to vector<16x64xf32>
    %6 = arith.addf %3, %5 : vector<16x64xf32>
    %cst_5 = arith.constant 0.000000e+00 : f32
    %7 = vector.broadcast %cst_5 : f32 to vector<16x64xf32>
    %8 = arith.maximumf %6, %7 : vector<16x64xf32>
    %9 = arith.truncf %8 : vector<16x64xf32> to vector<16x64xbf16>
    %c0_6 = arith.constant 0 : index
    %c0_7 = arith.constant 0 : index
    %10 = vector.load %arg4[%c0_6, %c0_7] : memref<64x128xbf16, #tpu.memory_space<vmem>>, vector<64x128xbf16>
    %cst_8 = arith.constant dense<0.000000e+00> : vector<16x128xf32>
    %11 = tpu.matmul %9, %10, %cst_8 {dimension_numbers = #tpu.dot_dimension_numbers<[1], [0], [0], [1], [0, 0, 1, 1], [], []>} : vector<16x64xbf16>, vector<64x128xbf16>, vector<16x128xf32> -> vector<16x128xf32>
    %c0_9 = arith.constant 0 : index
    %c0_10 = arith.constant 0 : index
    %12 = vector.load %arg5[%c0_9, %c0_10] : memref<1x128xf32, #tpu.memory_space<vmem>>, vector<1x128xf32>
    %13 = vector.broadcast %12 : vector<1x128xf32> to vector<16x128xf32>
    %14 = arith.addf %11, %13 : vector<16x128xf32>
    %15 = arith.negf %14 : vector<16x128xf32>
    %16 = math.exp %15 : vector<16x128xf32>
    %cst_11 = arith.constant 1.000000e+00 : f32
    %17 = vector.broadcast %cst_11 : f32 to vector<16x128xf32>
    %18 = arith.addf %17, %16 : vector<16x128xf32>
    %19 = arith.divf %17, %18 : vector<16x128xf32>
    %c0_12 = arith.constant 0 : index
    %c0_13 = arith.constant 0 : index
    %20 = vector.load %arg6[%c0_12, %c0_13] : memref<16x128xf32, #tpu.memory_space<vmem>>, vector<16x128xf32>
    tpu.vector_store %arg6[%c0_12, %c0_13], %19 {strides = array<i32>} : memref<16x128xf32, #tpu.memory_space<vmem>>, vector<16x128xf32>,
    return
  }
  func.func @transform_0(%arg0: i32) -> (i32, i32) {
    %c0_i32 = arith.constant 0 : i32
    %c0_i32_0 = arith.constant 0 : i32
    return %arg0, %c0_i32 : i32, i32
  }
  func.func @transform_1(%arg0: i32) -> (i32, i32) {
    %c0_i32 = arith.constant 0 : i32
    %c0_i32_0 = arith.constant 0 : i32
    %c0_i32_1 = arith.constant 0 : i32
    return %c0_i32, %c0_i32_0 : i32, i32
  }
  func.func @transform_2(%arg0: i32) -> (i32, i32) {
    %c0_i32 = arith.constant 0 : i32
    %c0_i32_0 = arith.constant 0 : i32
    %c0_i32_1 = arith.constant 0 : i32
    return %c0_i32, %c0_i32_0 : i32, i32
  }
  func.func @transform_3(%arg0: i32) -> (i32, i32) {
    %c0_i32 = arith.constant 0 : i32
    %c0_i32_0 = arith.constant 0 : i32
    %c0_i32_1 = arith.constant 0 : i32
    return %c0_i32, %c0_i32_0 : i32, i32
  }
  func.func @transform_4(%arg0: i32) -> (i32, i32) {
    %c0_i32 = arith.constant 0 : i32
    %c0_i32_0 = arith.constant 0 : i32
    %c0_i32_1 = arith.constant 0 : i32
    return %c0_i32, %c0_i32_0 : i32, i32
  }
  func.func @transform_5(%arg0: i32) -> (i32, i32) {
    %c0_i32 = arith.constant 0 : i32
    %c0_i32_0 = arith.constant 0 : i32
    return %arg0, %c0_i32 : i32, i32
  }
}

</mosaic_0001>

<bundles_post_ra>
// kernel: decoder_forward.1
= control target key start
LH: loop header
LB: loop body
LE: loop exit
PB: predicated region body
PF: predicated region fallthrough
CT: control target
= control target key end

     0   :  { %v253_v0 = vmov 0.0   ;;  %vm254_vm0 = vmmov 0   ;;  %vm47_vm1 = vcmask 261120   ;;  %vm134_vm2 = vcmask 523264   ;;  %s321_s1 = inlined_call_operand.vmem [shape: bf16[32,64], index: 1, kind: input, shape index: {}]   ;;  %s322_s0 = inlined_call_operand.vmem [shape: f32[16,32], index: 0, kind: input, shape index: {}]   ;;  %s323_s3 = inlined_call_operand.vmem [shape: bf16[64,128], index: 3, kind: input, shape index: {}]   ;;  %s324_s2 = inlined_call_operand.vmem [shape: f32[1,64], index: 2, kind: input, shape index: {}]   ;;  %s325_s4 = inlined_call_operand.vmem [shape: f32[1,128], index: 4, kind: input, shape index: {}]   ;;  %s326_s5 = inlined_call_operand.vmem [shape: f32[16,128], index: 5, kind: output, shape index: {}]  }
   0x1   :  { %217 = vmatprep.subr.bf16.mxu0 %v253_v0  ;;  %v239_v1 = vld [vmem:[%s321_s1 + $0x8] sm:$0xff]   ;;  %221 = vmatprep.mubr.msk.bf16.mxu0 %vm254_vm0, %v253_v0  ;;  %v240_v2 = vld [vmem:[%s321_s1] sm:$0xff]   ;;  %v241_v5 = vld [vmem:[%s323_s3 + $0x18] sm:$0xff]  }
   0x2   :  { %225 = vmatprep.subr.bf16.mxu1 %v253_v0  ;;  %233 = vmatprep.mubr.msk.bf16.mxu1 %vm254_vm0, %v253_v0  ;;  %v21_v3 = vld [vmem:[%s322_s0] sm:$0xff]  ;;  %v22_v4 = vld [vmem:[%s322_s0 + $0x8] sm:$0xff]  ;;  %v242_v7 = vld [vmem:[%s323_s3 + $0x10] sm:$0xff]  }
   0x3   :  { %218 = vmatpush3.bf16.msra.mxu0 %v239_v1  ;;  %v23_v6 = vpack.c.bf16 %v22_v4, %v21_v3  ;;  %226 = vmatpush3.bf16.msra.mxu1 %v241_v5  ;;  %v243_v8 = vld [vmem:[%s323_s3 + $0x8] sm:$0xff]   ;;  %v244_v9 = vld [vmem:[%s323_s3] sm:$0xff]  }
   0x4   :  { %219 = vmatprep.subr.bf16.mxu0 %v253_v0  ;;  %227 = vmatprep.subr.bf16.mxu1 %v253_v0  ;;  %v197_v10 = vld [vmem:[%s324_s2] ss:$0 sm:$0xff] }
   0x5   :  { %v201_v20 = vld [vmem:[%s325_s4] ss:$0 sm:$0xff] }
   0x7   :  { %220 = vmatpush3.bf16.msra.mxu0 %v240_v2  ;;  %228 = vmatpush3.bf16.msra.mxu1 %v242_v7 }
   0x8   :  { %229 = vmatprep.subr.bf16.mxu1 %v253_v0 }
   0xa   :  { %222 = vmatmul.mubr.msk.bf16.vlgmr.msra.gmra.mxu0 %vm47_vm1, %v23_v6 }
   0xb   :  { %230 = vmatpush3.bf16.msra.mxu1 %v243_v8 }
   0xc   :  { %231 = vmatprep.subr.bf16.mxu1 %v253_v0 }
   0xf   :  { %232 = vmatpush3.bf16.msra.mxu1 %v244_v9 }
  0xca   :  { %v85_v11 = vpop.f32.mrf.mxu0 }
  0xcb   :  { %v86_v13 = vadd.f32 %v197_v10, %v85_v11 }
  0xcc   :  { %v223_v12 = vpop.f32.mrf.mxu0 }
  0xcd   :  { %v92_v17 = vmax.f32 %v86_v13, 0.0 }
  0xce   :  { %v88_v14 = vpop.f32.mrf.mxu0 }
  0xcf   :  { %v89_v15 = vadd.f32 %v197_v10, %v88_v14 }
  0xd0   :  { %v224_v16 = vpop.f32.mrf.mxu0 }
  0xd1   :  { %v93_v18 = vmax.f32 %v89_v15, 0.0 }
  0xd3   :  { %v94_v19 = vpack.c.bf16 %v93_v18, %v92_v17 }
  0xd5   :  { %234 = vmatmul.mubr.msk.bf16.vlgmr.msra.gmra.mxu1 %vm134_vm2, %v94_v19 }
 0x195   :  { %v172_v21 = vpop.f32.mrf.mxu1 }
 0x196   :  { %v173_v22 = vadd.f32 %v201_v20, %v172_v21 }
 0x197   :  { %v235_v23 = vpop.f32.mrf.mxu1 }
 0x198   :  { %v207_v24 = vmul.f32 -1.442695, %v173_v22 }
 0x199   :  { %v175_v25 = vpop.f32.mrf.mxu1 }
 0x19a   :  { %245 = vpow2.f32 %v207_v24  ;;  %v176_v26 = vadd.f32 %v201_v20, %v175_v25 }
 0x19b   :  { %v236_v27 = vpop.f32.mrf.mxu1 }
 0x19c   :  { %v208_v28 = vmul.f32 -1.442695, %v176_v26 }
 0x19e   :  { %247 = vpow2.f32 %v208_v28 }
 0x1a7   :  { %v246_v29 = vpop.eup %245 }
 0x1a8   :  { %v185_v30 = vadd.f32 1.0, %v246_v29 }
 0x1aa   :  { %249 = vrcp.f32 %v185_v30 }
 0x1ab   :  { %v248_v31 = vpop.eup %247 }
 0x1ac   :  { %v186_v32 = vadd.f32 1.0, %v248_v31 }
 0x1ae   :  { %251 = vrcp.f32 %v186_v32 }
 0x1b7   :  { %v250_v33 = vpop.eup %249 }
 0x1b8   :  { %191 = vst [vmem:[%s326_s5] sm:$0xff] %v250_v33 }
 0x1bb   :  { %v252_v34 = vpop.eup %251 }
 0x1bc   :  { %192 = vst [vmem:[%s326_s5 + $0x8] sm:$0xff] %v252_v34 }

</bundles_post_ra>
